<compile_context>
chip_gen: v6e
topology: v6e:2x2x1
jax: 0.10.0
libtpu: 0.0.40
codegen_flags: <defaults>
</compile_context>

<pallas_src>
import jax
import jax.numpy as jnp
from jax.experimental import pallas as pl
from jax.experimental.pallas import tpu as pltpu

NEG_SLOPE = 0.01  # nn.LeakyReLU() default negative_slope


def _round_up(x, m):
    return ((x + m - 1) // m) * m


def _dmlp_kernel(x_ref, wg_ref, wu_ref, wd_ref, o_ref, acc_ref):
    # x_ref: [tm, H]   wg_ref/wu_ref: [H, ti]   wd_ref: [ti, H]
    # o_ref: [tm, H]   acc_ref: [tm, H] f32 scratch (resident across the k axis)
    k = pl.program_id(1)

    @pl.when(k == 0)
    def _init():
        acc_ref[...] = jnp.zeros_like(acc_ref)

    x = x_ref[...]
    g = jnp.dot(x, wg_ref[...], preferred_element_type=jnp.float32)   # [tm, ti] f32
    u = jnp.dot(x, wu_ref[...], preferred_element_type=jnp.float32)   # [tm, ti] f32
    act = jnp.where(g > 0, g, NEG_SLOPE * g)                          # LeakyReLU in f32
    h = (act * u).astype(wd_ref.dtype)                                # back to MXU input dtype
    acc_ref[...] += jnp.dot(h, wd_ref[...], preferred_element_type=jnp.float32)

    @pl.when(k == pl.num_programs(1) - 1)
    def _finalize():
        o_ref[...] = acc_ref[...].astype(o_ref.dtype)


def dmlp_forward(x, wg, wu, wd, *, block_m=256, block_i=512, compute_dtype=None):
    """x: [..., H]. wg/wu: [H, I], wd: [I, H]. Returns [..., H] in x.dtype.

    compute_dtype: optional dtype (e.g. jnp.bfloat16) for the MXU inputs;
    accumulation is always f32. None => compute in x.dtype (exact f32 path).
    block_m / block_i: tile sizes. Defaults (256, 512) fit all of v5e/v6e/v7x;
    on v6e (128 MiB VMEM) larger tiles (e.g. 512 / 1024-2048) amortize per-step overhead.
    """
    orig_shape = x.shape
    H = orig_shape[-1]
    I = wg.shape[1]
    assert wg.shape == (H, I) and wu.shape == (H, I) and wd.shape == (I, H)

    out_dtype = x.dtype
    if compute_dtype is not None:
        x = x.astype(compute_dtype)
        wg = wg.astype(compute_dtype)
        wu = wu.astype(compute_dtype)
        wd = wd.astype(compute_dtype)

    x2d = x.reshape(-1, H)
    M = x2d.shape[0]

    # Lane/sublane-aligned padded sizes (no-ops for 128-multiple production shapes).
    Hp = _round_up(H, 128)
    tm = min(block_m, _round_up(M, 8))
    Mp = _round_up(M, tm)
    ti = min(block_i, _round_up(I, 128))
    Ip = _round_up(I, ti)

    if (Mp, Hp) != (M, H):
        x2d = jnp.pad(x2d, ((0, Mp - M), (0, Hp - H)))
    if (Hp, Ip) != (H, I):
        wg = jnp.pad(wg, ((0, Hp - H), (0, Ip - I)))
        wu = jnp.pad(wu, ((0, Hp - H), (0, Ip - I)))
        wd = jnp.pad(wd, ((0, Ip - I), (0, Hp - H)))

    grid = (Mp // tm, Ip // ti)

    c_item = jnp.dtype(x2d.dtype).itemsize
    o_item = jnp.dtype(out_dtype).itemsize
    # Double-buffered input/output blocks + resident f32 accumulator + in-kernel
    # f32 intermediates (g, u, act, h), then headroom; cap at v7x physical 64 MiB.
    vmem_needed = (
        2 * (tm * Hp * c_item + 2 * Hp * ti * c_item + ti * Hp * c_item + tm * Hp * o_item)
        + tm * Hp * 4
        + 4 * tm * ti * 4
    )
    vmem_limit = int(min(max(int(vmem_needed * 1.5), 16 * 1024 * 1024), 64 * 1024 * 1024))

    cost = pl.CostEstimate(
        flops=6 * Mp * Ip * Hp,
        transcendentals=0,
        bytes_accessed=int(
            x2d.size * c_item + (wg.size + wu.size + wd.size) * c_item + Mp * Hp * o_item
        ),
    )

    # TODO(synk): optionally fuse wg/wu into a single stacked weight stream to cut DMA
    # descriptors; skipped here to avoid a per-call HBM concat of the weights.
    out = pl.pallas_call(
        _dmlp_kernel,
        out_shape=jax.ShapeDtypeStruct((Mp, Hp), out_dtype),
        grid_spec=pltpu.PrefetchScalarGridSpec(
            num_scalar_prefetch=0,
            grid=grid,
            in_specs=[
                pl.BlockSpec((tm, Hp), lambda i, k: (i, 0)),   # x:  same block across k
                pl.BlockSpec((Hp, ti), lambda i, k: (0, k)),   # wg: I-tile k
                pl.BlockSpec((Hp, ti), lambda i, k: (0, k)),   # wu: I-tile k
                pl.BlockSpec((ti, Hp), lambda i, k: (k, 0)),   # wd: I-tile k
            ],
            out_specs=pl.BlockSpec((tm, Hp), lambda i, k: (i, 0)),  # resident across k
            scratch_shapes=[pltpu.VMEM((tm, Hp), jnp.float32)],
        ),
        compiler_params=pltpu.CompilerParams(
            dimension_semantics=("parallel", "arbitrary"),
            vmem_limit_bytes=vmem_limit,
        ),
        cost_estimate=cost,
    )(x2d, wg, wu, wd)

    out = out[:M, :H]
    return out.reshape(orig_shape)


def dmlp_reference(x, wg, wu, wd):
    g = x @ wg
    u = x @ wu
    act = jnp.where(g > 0, g, NEG_SLOPE * g)
    return (act * u) @ wd


if __name__ == "__main__":
    key = jax.random.PRNGKey(0)
    batch, seq, hidden, intermediate = 2, 8, 32, 64

    kx, kg, ku, kd = jax.random.split(key, 4)
    bound_h = 1.0 / (hidden ** 0.5)
    bound_i = 1.0 / (intermediate ** 0.5)
    x = jax.random.normal(kx, (batch, seq, hidden), dtype=jnp.float32)
    # PyTorch gate_proj.weight is [I, H]; the kernel consumes the transpose [H, I].
    wg = jax.random.uniform(kg, (hidden, intermediate), jnp.float32, -bound_h, bound_h)
    wu = jax.random.uniform(ku, (hidden, intermediate), jnp.float32, -bound_h, bound_h)
    wd = jax.random.uniform(kd, (intermediate, hidden), jnp.float32, -bound_i, bound_i)

    y_ref = dmlp_reference(x, wg, wu, wd)

    # Exact f32 path — matches the PyTorch module.
    y = dmlp_forward(x, wg, wu, wd)
    jax.block_until_ready(y)
    assert y.shape == x.shape
    assert jnp.allclose(y, y_ref, atol=1e-5, rtol=1e-5), "f32 path mismatch vs reference"

    # Production-speed bf16 MXU path (f32 accumulation) — looser tolerance expected.
    y_bf16 = dmlp_forward(x, wg, wu, wd, compute_dtype=jnp.bfloat16)
    jax.block_until_ready(y_bf16)
    assert jnp.allclose(y_bf16.astype(jnp.float32), y_ref, atol=5e-2, rtol=5e-2), \
        "bf16 path mismatch vs reference"

    print("KERNEL_OK")
</pallas_src>

<mosaic_0001>
module attributes {stable_mosaic.version = 11 : i64} {
  func.func @_dmlp_kernel(%arg0: i32, %arg1: i32, %arg2: memref<16x128xf32, #tpu.memory_space<vmem>>, %arg3: memref<128x128xf32, #tpu.memory_space<vmem>>, %arg4: memref<128x128xf32, #tpu.memory_space<vmem>>, %arg5: memref<128x128xf32, #tpu.memory_space<vmem>>, %arg6: memref<16x128xf32, #tpu.memory_space<vmem>>, %arg7: memref<16x128xf32, #tpu.memory_space<vmem>>) attributes {dimension_semantics = [#tpu.dimension_semantics<parallel>, #tpu.dimension_semantics<arbitrary>], iteration_bounds = array<i64: 1, 1>, scalar_prefetch = 0 : i64, scratch_operands = 1 : i64, tpu.core_type = #tpu.core_type<tc>, window_params = [{transform_indices = @transform_0, window_bounds = array<i64: 16, 128>}, {transform_indices = @transform_1, window_bounds = array<i64: 128, 128>}, {transform_indices = @transform_2, window_bounds = array<i64: 128, 128>}, {transform_indices = @transform_3, window_bounds = array<i64: 128, 128>}, {transform_indices = @transform_4, window_bounds = array<i64: 16, 128>}]} {
    %c0_i32 = arith.constant 0 : i32
    %0 = arith.cmpi eq, %arg1, %c0_i32 : i32
    %1 = arith.extui %0 : i1 to i32
    %c0_i32_0 = arith.constant 0 : i32
    %2 = arith.cmpi ne, %1, %c0_i32_0 : i32
    scf.if %2 {
      %cst_18 = arith.constant 0.000000e+00 : f32
      %22 = vector.broadcast %cst_18 : f32 to vector<16x128xf32>
      %c0_19 = arith.constant 0 : index
      %c0_20 = arith.constant 0 : index
      %23 = vector.load %arg7[%c0_19, %c0_20] : memref<16x128xf32, #tpu.memory_space<vmem>>, vector<16x128xf32>
      tpu.vector_store %arg7[%c0_19, %c0_20], %22 {strides = array<i32>} : memref<16x128xf32, #tpu.memory_space<vmem>>, vector<16x128xf32>,
    } else {
    }
    %c0 = arith.constant 0 : index
    %c0_1 = arith.constant 0 : index
    %3 = vector.load %arg2[%c0, %c0_1] : memref<16x128xf32, #tpu.memory_space<vmem>>, vector<16x128xf32>
    %c0_2 = arith.constant 0 : index
    %c0_3 = arith.constant 0 : index
    %4 = vector.load %arg3[%c0_2, %c0_3] : memref<128x128xf32, #tpu.memory_space<vmem>>, vector<128x128xf32>
    %cst = arith.constant dense<0.000000e+00> : vector<16x128xf32>
    %5 = tpu.matmul %3, %4, %cst {dimension_numbers = #tpu.dot_dimension_numbers<[1], [0], [0], [1], [0, 0, 1, 1], [], []>} : vector<16x128xf32>, vector<128x128xf32>, vector<16x128xf32> -> vector<16x128xf32>
    %c0_4 = arith.constant 0 : index
    %c0_5 = arith.constant 0 : index
    %6 = vector.load %arg4[%c0_4, %c0_5] : memref<128x128xf32, #tpu.memory_space<vmem>>, vector<128x128xf32>
    %cst_6 = arith.constant dense<0.000000e+00> : vector<16x128xf32>
    %7 = tpu.matmul %3, %6, %cst_6 {dimension_numbers = #tpu.dot_dimension_numbers<[1], [0], [0], [1], [0, 0, 1, 1], [], []>} : vector<16x128xf32>, vector<128x128xf32>, vector<16x128xf32> -> vector<16x128xf32>
    %cst_7 = arith.constant 0.000000e+00 : f32
    %8 = vector.broadcast %cst_7 : f32 to vector<16x128xf32>
    %9 = arith.cmpf ogt, %5, %8 : vector<16x128xf32>
    %cst_8 = arith.constant 0.00999999977 : f32
    %10 = vector.broadcast %cst_8 : f32 to vector<16x128xf32>
    %11 = arith.mulf %10, %5 : vector<16x128xf32>
    %12 = arith.select %9, %5, %11 : vector<16x128xi1>, vector<16x128xf32>
    %13 = arith.mulf %12, %7 : vector<16x128xf32>
    %c0_9 = arith.constant 0 : index
    %c0_10 = arith.constant 0 : index
    %14 = vector.load %arg7[%c0_9, %c0_10] : memref<16x128xf32, #tpu.memory_space<vmem>>, vector<16x128xf32>
    %c0_11 = arith.constant 0 : index
    %c0_12 = arith.constant 0 : index
    %15 = vector.load %arg5[%c0_11, %c0_12] : memref<128x128xf32, #tpu.memory_space<vmem>>, vector<128x128xf32>
    %cst_13 = arith.constant dense<0.000000e+00> : vector<16x128xf32>
    %16 = tpu.matmul %13, %15, %cst_13 {dimension_numbers = #tpu.dot_dimension_numbers<[1], [0], [0], [1], [0, 0, 1, 1], [], []>} : vector<16x128xf32>, vector<128x128xf32>, vector<16x128xf32> -> vector<16x128xf32>
    %17 = arith.addf %14, %16 : vector<16x128xf32>
    %c0_14 = arith.constant 0 : index
    %c0_15 = arith.constant 0 : index
    %18 = vector.load %arg7[%c0_14, %c0_15] : memref<16x128xf32, #tpu.memory_space<vmem>>, vector<16x128xf32>
    tpu.vector_store %arg7[%c0_14, %c0_15], %17 {strides = array<i32>} : memref<16x128xf32, #tpu.memory_space<vmem>>, vector<16x128xf32>,
    %c0_i32_16 = arith.constant 0 : i32
    %19 = arith.cmpi eq, %arg1, %c0_i32_16 : i32
    %20 = arith.extui %19 : i1 to i32
    %c0_i32_17 = arith.constant 0 : i32
    %21 = arith.cmpi ne, %20, %c0_i32_17 : i32
    scf.if %21 {
      %c0_18 = arith.constant 0 : index
      %c0_19 = arith.constant 0 : index
      %22 = vector.load %arg7[%c0_18, %c0_19] : memref<16x128xf32, #tpu.memory_space<vmem>>, vector<16x128xf32>
      %c0_20 = arith.constant 0 : index
      %c0_21 = arith.constant 0 : index
      %23 = vector.load %arg6[%c0_20, %c0_21] : memref<16x128xf32, #tpu.memory_space<vmem>>, vector<16x128xf32>
      tpu.vector_store %arg6[%c0_20, %c0_21], %22 {strides = array<i32>} : memref<16x128xf32, #tpu.memory_space<vmem>>, vector<16x128xf32>,
    } else {
    }
    return
  }
  func.func @transform_0(%arg0: i32, %arg1: i32) -> (i32, i32) {
    %c0_i32 = arith.constant 0 : i32
    %c0_i32_0 = arith.constant 0 : i32
    return %arg0, %c0_i32 : i32, i32
  }
  func.func @transform_1(%arg0: i32, %arg1: i32) -> (i32, i32) {
    %c0_i32 = arith.constant 0 : i32
    %c0_i32_0 = arith.constant 0 : i32
    return %c0_i32, %arg1 : i32, i32
  }
  func.func @transform_2(%arg0: i32, %arg1: i32) -> (i32, i32) {
    %c0_i32 = arith.constant 0 : i32
    %c0_i32_0 = arith.constant 0 : i32
    return %c0_i32, %arg1 : i32, i32
  }
  func.func @transform_3(%arg0: i32, %arg1: i32) -> (i32, i32) {
    %c0_i32 = arith.constant 0 : i32
    %c0_i32_0 = arith.constant 0 : i32
    return %arg1, %c0_i32 : i32, i32
  }
  func.func @transform_4(%arg0: i32, %arg1: i32) -> (i32, i32) {
    %c0_i32 = arith.constant 0 : i32
    %c0_i32_0 = arith.constant 0 : i32
    return %arg0, %c0_i32 : i32, i32
  }
}

</mosaic_0001>

<bundles_post_ra>
// kernel: tpu_custom_call.1
= control target key start
LH: loop header
LB: loop body
LE: loop exit
PB: predicated region body
PF: predicated region fallthrough
CT: control target
= control target key end

     0   :  { %9 = vsyncpa [#allocation4], 0  ;;  %s730_s0 = inlined_call_operand.hbm [shape: f32[16,128], index: 0, kind: input, shape index: {}]   ;;  %s731_s1 = inlined_call_operand.hbm [shape: f32[128,128], index: 1, kind: input, shape index: {}]   ;;  %s732_s2 = inlined_call_operand.hbm [shape: f32[128,128], index: 2, kind: input, shape index: {}]   ;;  %s733_s3 = inlined_call_operand.hbm [shape: f32[128,128], index: 3, kind: input, shape index: {}]   ;;  %s734_s4 = inlined_call_operand.hbm [shape: f32[16,128], index: 4, kind: output, shape index: {}]  }
   0x1   :  { %10 = vsyncpa [#allocation7], 0 }
   0x2   :  { %11 = vsyncpa [#allocation10], 0 }
   0x3   :  { %12 = vsyncpa [#allocation5], 0  ;;  %s668_s15 = smov [#allocation6]   ;;  %s669_s17 = smov [#allocation3]  }
   0x4   :  { %s30_s16 = sshll.u32 %s668_s15, 4  ;;  %s18_s18 = sshll.u32 %s669_s17, 4  ;;  %s31_s16 = int_to_ptr.vmem [resolvable:$true] %s30_s16  ;;  %s19_s18 = int_to_ptr.vmem [resolvable:$true] %s18_s18 }
   0x5   :  { %s568_s19 = scalar_lea.vmem %s31_s16, 2048  ;;  %p573_p1 = scmp.lt.s32.totalorder %s31_s16, %s31_s16 }
   0x6   :  { %p569_p0 = scmp.ne.s32.totalorder %s31_s16, %s568_s19  ;;  %p574_p2 = scmp.lt.s32.totalorder %s568_s19, %s568_s19 }
   0x8   :  { %p575_p3 = por %p574_p2, %p573_p1 }
   0xa   :  { %p576_p4 = pnand %p575_p3, %p569_p0 }
   0xc   :  { %579 = shalt.err (!%p576_p4)
}
   0xd   :  { %s670_s20 = smov 128   ;;  %s671_s21 = smov 8  }
   0xe   :  { %36 = dma.hbm_to_vmem [thread:$0]  %s731_s1, 2048, %s31_s16, [#allocation7], %s670_s20, %s670_s20, %s671_s21  }
   0xf   :  { %s588_s24 = scalar_lea.vmem %s19_s18, 256  ;;  %p593_p6 = scmp.lt.s32.totalorder %s19_s18, %s19_s18 }
  0x10   :  { %p589_p5 = scmp.ne.s32.totalorder %s19_s18, %s588_s24  ;;  %p594_p7 = scmp.lt.s32.totalorder %s588_s24, %s588_s24 }
  0x12   :  { %p595_p8 = por %p594_p7, %p593_p6 }
  0x14   :  { %p596_p9 = pnand %p595_p8, %p589_p5 }
  0x16   :  { %599 = shalt.err (!%p596_p9)
}
  0x17   :  { %24 = dma.hbm_to_vmem [thread:$0]  %s730_s0, 256, %s19_s18, [#allocation4], %s670_s20, %s670_s20, %s671_s21  }
  0x18   :  { %s672_s27 = smov [#allocation8]   ;;  %s673_s29 = smov [#allocation9]  }
  0x19   :  { %s42_s28 = sshll.u32 %s672_s27, 4  ;;  %s54_s30 = sshll.u32 %s673_s29, 4  ;;  %s43_s28 = int_to_ptr.vmem [resolvable:$true] %s42_s28  ;;  %s55_s30 = int_to_ptr.vmem [resolvable:$true] %s54_s30 }
  0x1a   :  { %s608_s1 = scalar_lea.vmem %s43_s28, 2048  ;;  %p613_p11 = scmp.lt.s32.totalorder %s43_s28, %s43_s28 }
  0x1b   :  { %p609_p10 = scmp.ne.s32.totalorder %s43_s28, %s608_s1  ;;  %p614_p12 = scmp.lt.s32.totalorder %s608_s1, %s608_s1 }
  0x1d   :  { %p615_p13 = por %p614_p12, %p613_p11 }
  0x1f   :  { %p616_p0 = pnand %p615_p13, %p609_p10 }
  0x21   :  { %619 = shalt.err (!%p616_p0)
}
  0x22   :  { %48 = dma.hbm_to_vmem [thread:$0]  %s732_s2, 2048, %s43_s28, [#allocation7], %s670_s20, %s670_s20, %s671_s21  }
  0x23   :  { %s628_s0 = scalar_lea.vmem %s55_s30, 2048  ;;  %p633_p2 = scmp.lt.s32.totalorder %s55_s30, %s55_s30 }
  0x24   :  { %p629_p1 = scmp.ne.s32.totalorder %s55_s30, %s628_s0  ;;  %p634_p3 = scmp.lt.s32.totalorder %s628_s0, %s628_s0 }
  0x26   :  { %p635_p4 = por %p634_p3, %p633_p2 }
  0x28   :  { %p636_p5 = pnand %p635_p4, %p629_p1 }
  0x2a   :  { %639 = shalt.err (!%p636_p5)
}
  0x2b   :  { %60 = dma.hbm_to_vmem [thread:$0]  %s733_s3, 2048, %s55_s30, [#allocation10], %s670_s20, %s670_s20, %s671_s21  }
  0x2c   :  { %660 = dma.done.wait [#allocation4], 256  }
  0x2d   :  { %661 = vsyncadd [#allocation4], 4294967040 }
  0x2e   :  { %662 = dma.done.wait [#allocation7], 4096  }
  0x2f   :  { %663 = vsyncadd [#allocation7], 4294963200 }
  0x30   :  { %664 = dma.done.wait [#allocation10], 2048  }
  0x31   :  { %665 = vsyncadd [#allocation10], 4294965248  ;;  %v96_v0 = vld [vmem:[#allocation6 + $0x78] sm:$0xff]  ;;  %v95_v2 = vld [vmem:[#allocation6 + $0x70] sm:$0xff]  ;;  %s674_s2 = smov [#allocation11]  }
  0x32   :  { %v187_v1 = vld [vmem:[#allocation8 + $0x78] sm:$0xff]  ;;  %448 = vmatprep.subr.mxu0 %v96_v0  ;;  %v186_v3 = vld [vmem:[#allocation8 + $0x70] sm:$0xff]  ;;  %v94_v4 = vld [vmem:[#allocation6 + $0x68] sm:$0xff]  ;;  %s380_s3 = sshll.u32 %s674_s2, 4  ;;  %s381_s3 = int_to_ptr.vmem [resolvable:$true] %s380_s3 }
  0x33   :  { %483 = vmatprep.subr.mxu1 %v187_v1  ;;  %449 = vmatpush3.msra.mxu0 %v96_v0  ;;  %v185_v5 = vld [vmem:[#allocation8 + $0x68] sm:$0xff]  ;;  %v93_v6 = vld [vmem:[#allocation6 + $0x60] sm:$0xff]  ;;  %v92_v8 = vld [vmem:[#allocation6 + $0x58] sm:$0xff]  ;;  %s640_s9 = scalar_lea.vmem %s381_s3, 256  ;;  %p645_p7 = scmp.lt.s32.totalorder %s381_s3, %s381_s3 }
  0x34   :  { %484 = vmatpush3.msra.mxu1 %v187_v1  ;;  %450 = vmatprep.subr.mxu0 %v95_v2  ;;  %v184_v7 = vld [vmem:[#allocation8 + $0x60] sm:$0xff]  ;;  %v183_v9 = vld [vmem:[#allocation8 + $0x58] sm:$0xff]  ;;  %v91_v10 = vld [vmem:[#allocation6 + $0x50] sm:$0xff]  ;;  %p641_p6 = scmp.ne.s32.totalorder %s381_s3, %s640_s9  ;;  %p646_p8 = scmp.lt.s32.totalorder %s640_s9, %s640_s9 }
  0x35   :  { %485 = vmatprep.subr.mxu1 %v186_v3  ;;  %451 = vmatpush3.msra.mxu0 %v95_v2  ;;  %v182_v11 = vld [vmem:[#allocation8 + $0x50] sm:$0xff]  ;;  %v90_v12 = vld [vmem:[#allocation6 + $0x48] sm:$0xff]  ;;  %v89_v14 = vld [vmem:[#allocation6 + $0x40] sm:$0xff] }
  0x36   :  { %486 = vmatpush3.msra.mxu1 %v186_v3  ;;  %452 = vmatprep.subr.mxu0 %v94_v4  ;;  %v181_v13 = vld [vmem:[#allocation8 + $0x48] sm:$0xff]  ;;  %v180_v15 = vld [vmem:[#allocation8 + $0x40] sm:$0xff]  ;;  %v88_v16 = vld [vmem:[#allocation6 + $0x38] sm:$0xff]  ;;  %p647_p9 = por %p646_p8, %p645_p7 }
  0x37   :  { %487 = vmatprep.subr.mxu1 %v185_v5  ;;  %453 = vmatpush3.msra.mxu0 %v94_v4  ;;  %v179_v17 = vld [vmem:[#allocation8 + $0x38] sm:$0xff]  ;;  %v87_v18 = vld [vmem:[#allocation6 + $0x30] sm:$0xff]  ;;  %v86_v20 = vld [vmem:[#allocation6 + $0x28] sm:$0xff] }
  0x38   :  { %488 = vmatpush3.msra.mxu1 %v185_v5  ;;  %454 = vmatprep.subr.mxu0 %v93_v6  ;;  %v178_v19 = vld [vmem:[#allocation8 + $0x30] sm:$0xff]  ;;  %v177_v21 = vld [vmem:[#allocation8 + $0x28] sm:$0xff]  ;;  %v85_v22 = vld [vmem:[#allocation6 + $0x20] sm:$0xff]  ;;  %p648_p10 = pnand %p647_p9, %p641_p6 }
  0x39   :  { %489 = vmatprep.subr.mxu1 %v184_v7  ;;  %455 = vmatpush3.msra.mxu0 %v93_v6  ;;  %v176_v23 = vld [vmem:[#allocation8 + $0x20] sm:$0xff]  ;;  %v84_v24 = vld [vmem:[#allocation6 + $0x18] sm:$0xff]  ;;  %v83_v26 = vld [vmem:[#allocation6 + $0x10] sm:$0xff] }
  0x3a   :  { %490 = vmatpush3.msra.mxu1 %v184_v7  ;;  %456 = vmatprep.subr.mxu0 %v92_v8  ;;  %v175_v25 = vld [vmem:[#allocation8 + $0x18] sm:$0xff]  ;;  %v174_v27 = vld [vmem:[#allocation8 + $0x10] sm:$0xff]  ;;  %v82_v28 = vld [vmem:[#allocation6 + $0x8] sm:$0xff] }
  0x3b   :  { %491 = vmatprep.subr.mxu1 %v183_v9  ;;  %457 = vmatpush3.msra.mxu0 %v92_v8  ;;  %v173_v29 = vld [vmem:[#allocation8 + $0x8] sm:$0xff]  ;;  %v81_v30 = vld [vmem:[#allocation6] sm:$0xff]  ;;  %v79_v31 = vld [vmem:[#allocation3] sm:$0xff] }
  0x3c   :  { %492 = vmatpush3.msra.mxu1 %v183_v9  ;;  %458 = vmatprep.subr.mxu0 %v91_v10  ;;  %v172_v32 = vld [vmem:[#allocation8] sm:$0xff]  ;;  %v80_v33 = vld [vmem:[#allocation3 + $0x8] sm:$0xff]  ;;  %v287_v35 = vld [vmem:[#allocation9 + $0x70] sm:$0xff] }
  0x3d   :  { %493 = vmatprep.subr.mxu1 %v182_v11  ;;  %459 = vmatpush3.msra.mxu0 %v91_v10  ;;  %v288_v34 = vld [vmem:[#allocation9 + $0x78] sm:$0xff]  ;;  %v286_v36 = vld [vmem:[#allocation9 + $0x68] sm:$0xff]  ;;  %v285_v37 = vld [vmem:[#allocation9 + $0x60] sm:$0xff] }
  0x3e   :  { %494 = vmatpush3.msra.mxu1 %v182_v11  ;;  %460 = vmatprep.subr.mxu0 %v90_v12  ;;  %v284_v38 = vld [vmem:[#allocation9 + $0x58] sm:$0xff]  ;;  %v283_v39 = vld [vmem:[#allocation9 + $0x50] sm:$0xff]  ;;  %v282_v40 = vld [vmem:[#allocation9 + $0x48] sm:$0xff] }
  0x3f   :  { %495 = vmatprep.subr.mxu1 %v181_v13  ;;  %461 = vmatpush3.msra.mxu0 %v90_v12  ;;  %v281_v41 = vld [vmem:[#allocation9 + $0x40] sm:$0xff]  ;;  %v280_v42 = vld [vmem:[#allocation9 + $0x38] sm:$0xff]  ;;  %v279_v43 = vld [vmem:[#allocation9 + $0x30] sm:$0xff] }
  0x40   :  { %496 = vmatpush3.msra.mxu1 %v181_v13  ;;  %462 = vmatprep.subr.mxu0 %v89_v14  ;;  %v278_v44 = vld [vmem:[#allocation9 + $0x28] sm:$0xff]  ;;  %v277_v45 = vld [vmem:[#allocation9 + $0x20] sm:$0xff]  ;;  %v276_v46 = vld [vmem:[#allocation9 + $0x18] sm:$0xff] }
  0x41   :  { %497 = vmatprep.subr.mxu1 %v180_v15  ;;  %463 = vmatpush3.msra.mxu0 %v89_v14  ;;  %v275_v47 = vld [vmem:[#allocation9 + $0x10] sm:$0xff]  ;;  %v274_v48 = vld [vmem:[#allocation9 + $0x8] sm:$0xff]  ;;  %v273_v49 = vld [vmem:[#allocation9] sm:$0xff] }
  0x42   :  { %498 = vmatpush3.msra.mxu1 %v180_v15  ;;  %464 = vmatprep.subr.mxu0 %v88_v16 }
  0x43   :  { %499 = vmatprep.subr.mxu1 %v179_v17  ;;  %465 = vmatpush3.msra.mxu0 %v88_v16 }
  0x44   :  { %500 = vmatpush3.msra.mxu1 %v179_v17  ;;  %466 = vmatprep.subr.mxu0 %v87_v18 }
  0x45   :  { %501 = vmatprep.subr.mxu1 %v178_v19  ;;  %467 = vmatpush3.msra.mxu0 %v87_v18 }
  0x46   :  { %502 = vmatpush3.msra.mxu1 %v178_v19  ;;  %468 = vmatprep.subr.mxu0 %v86_v20 }
  0x47   :  { %503 = vmatprep.subr.mxu1 %v177_v21  ;;  %469 = vmatpush3.msra.mxu0 %v86_v20 }
  0x48   :  { %504 = vmatpush3.msra.mxu1 %v177_v21  ;;  %470 = vmatprep.subr.mxu0 %v85_v22 }
  0x49   :  { %505 = vmatprep.subr.mxu1 %v176_v23  ;;  %471 = vmatpush3.msra.mxu0 %v85_v22 }
  0x4a   :  { %506 = vmatpush3.msra.mxu1 %v176_v23  ;;  %472 = vmatprep.subr.mxu0 %v84_v24 }
  0x4b   :  { %507 = vmatprep.subr.mxu1 %v175_v25  ;;  %473 = vmatpush3.msra.mxu0 %v84_v24 }
  0x4c   :  { %508 = vmatpush3.msra.mxu1 %v175_v25  ;;  %474 = vmatprep.subr.mxu0 %v83_v26 }
  0x4d   :  { %509 = vmatprep.subr.mxu1 %v174_v27  ;;  %475 = vmatpush3.msra.mxu0 %v83_v26 }
  0x4e   :  { %510 = vmatpush3.msra.mxu1 %v174_v27  ;;  %476 = vmatprep.subr.mxu0 %v82_v28 }
  0x4f   :  { %511 = vmatprep.subr.mxu1 %v173_v29  ;;  %477 = vmatpush3.msra.mxu0 %v82_v28 }
  0x50   :  { %512 = vmatpush3.msra.mxu1 %v173_v29  ;;  %478 = vmatprep.subr.mxu0 %v81_v30 }
  0x51   :  { %480 = vmatprep.mubr.f32.mxu0 %v79_v31  ;;  %479 = vmatpush3.msra.mxu0 %v81_v30 }
  0x52   :  { %513 = vmatprep.subr.mxu1 %v172_v32  ;;  %481 = vmatmul.mubr.f32.vlgmr.msra.gmra.mxu0 %v80_v33 }
  0x53   :  { %514 = vmatpush3.msra.mxu1 %v172_v32  ;;  %515 = vmatprep.mubr.f32.mxu1 %v79_v31 }
  0x54   :  { %518 = vmatprep.subr.mxu0 %v288_v34  ;;  %516 = vmatmul.mubr.f32.vlgmr.msra.gmra.mxu1 %v80_v33 }
  0x55   :  { %519 = vmatpush3.msra.mxu0 %v288_v34 }
  0x56   :  { %520 = vmatprep.subr.mxu0 %v287_v35 }
  0x57   :  { %521 = vmatpush3.msra.mxu0 %v287_v35 }
  0x58   :  { %522 = vmatprep.subr.mxu0 %v286_v36 }
  0x59   :  { %523 = vmatpush3.msra.mxu0 %v286_v36 }
  0x5a   :  { %524 = vmatprep.subr.mxu0 %v285_v37 }
  0x5b   :  { %525 = vmatpush3.msra.mxu0 %v285_v37 }
  0x5c   :  { %526 = vmatprep.subr.mxu0 %v284_v38 }
  0x5d   :  { %527 = vmatpush3.msra.mxu0 %v284_v38 }
  0x5e   :  { %528 = vmatprep.subr.mxu0 %v283_v39 }
  0x5f   :  { %529 = vmatpush3.msra.mxu0 %v283_v39 }
  0x60   :  { %530 = vmatprep.subr.mxu0 %v282_v40 }
  0x61   :  { %531 = vmatpush3.msra.mxu0 %v282_v40 }
  0x62   :  { %532 = vmatprep.subr.mxu0 %v281_v41 }
  0x63   :  { %533 = vmatpush3.msra.mxu0 %v281_v41 }
  0x64   :  { %534 = vmatprep.subr.mxu0 %v280_v42 }
  0x65   :  { %535 = vmatpush3.msra.mxu0 %v280_v42 }
  0x66   :  { %536 = vmatprep.subr.mxu0 %v279_v43 }
  0x67   :  { %537 = vmatpush3.msra.mxu0 %v279_v43 }
  0x68   :  { %538 = vmatprep.subr.mxu0 %v278_v44 }
  0x69   :  { %539 = vmatpush3.msra.mxu0 %v278_v44 }
  0x6a   :  { %540 = vmatprep.subr.mxu0 %v277_v45 }
  0x6b   :  { %541 = vmatpush3.msra.mxu0 %v277_v45 }
  0x6c   :  { %542 = vmatprep.subr.mxu0 %v276_v46 }
  0x6d   :  { %543 = vmatpush3.msra.mxu0 %v276_v46 }
  0x6e   :  { %544 = vmatprep.subr.mxu0 %v275_v47 }
  0x6f   :  { %545 = vmatpush3.msra.mxu0 %v275_v47 }
  0x70   :  { %546 = vmatprep.subr.mxu0 %v274_v48 }
  0x71   :  { %547 = vmatpush3.msra.mxu0 %v274_v48 }
  0x72   :  { %548 = vmatprep.subr.mxu0 %v273_v49 }
  0x73   :  { %549 = vmatpush3.msra.mxu0 %v273_v49 }
 0x112   :  { %v482_v50 = vpop.f32.mrf.mxu0 }
 0x113   :  { %vm264_vm0 = vcmp.gt.f32.partialorder %v482_v50, 0.0  ;;  %v266_v51 = vmul.f32 0.01, %v482_v50 }
 0x114   :  { %v517_v52 = vpop.f32.mrf.mxu1  ;;  %v163_v53 = vpop.f32.mrf.mxu0 }
 0x115   :  { %vm263_vm1 = vcmp.gt.f32.partialorder %v163_v53, 0.0  ;;  %v265_v54 = vmul.f32 0.01, %v163_v53  ;;  %v268_v55 = vsel %vm264_vm0, %v482_v50, %v266_v51 }
 0x116   :  { %v254_v56 = vpop.f32.mrf.mxu1  ;;  %v270_v59 = vmul.f32 %v517_v52, %v268_v55 }
 0x117   :  { %v267_v57 = vsel %vm263_vm1, %v163_v53, %v265_v54 }
 0x118   :  { %v269_v58 = vmul.f32 %v267_v57, %v254_v56 }
 0x11a   :  { %550 = vmatprep.mubr.f32.mxu0 %v269_v58 }
 0x11b   :  { %551 = vmatmul.mubr.f32.vlgmr.msra.gmra.mxu0 %v270_v59 }
 0x1db   :  { %v552_v60 = vpop.f32.mrf.mxu0 }
 0x1dc   :  { %374 = vst [vmem:[#allocation11 + $0x8] sm:$0xff] %v552_v60 }
 0x1dd   :  { %v355_v61 = vpop.f32.mrf.mxu0 }
 0x1de   :  { %373 = vst [vmem:[#allocation11] sm:$0xff] %v355_v61 }
 0x1df   :  { %651 = shalt.err (!%p648_p10)
}
 0x1e0   :  { %386 = dma.vmem_to_hbm [thread:$0]  %s381_s3, 256, %s734_s4, [#allocation5], %s670_s20, %s670_s20, %s671_s21  }
 0x1e1   :  { %666 = dma.done.wait [#allocation5], 256  }
 0x1e2   :  { %667 = vsyncadd [#allocation5], 4294967040 }
 0x1e3   :  { %390 = vsyncpa [#allocation4], 1 }
 0x1e4   :  { %391 = vsyncpa [#allocation7], 1 }
 0x1e5   :  { %392 = vsyncpa [#allocation10], 1 }
 0x1e6   :  { %393 = vsyncpa [#allocation5], 1 }

</bundles_post_ra>
